<compile_context>
chip_gen: v7x
topology: tpu7x:2x2x1
jax: 0.10.0
libtpu: 0.0.40
codegen_flags: <defaults>
</compile_context>

<pallas_src>
import functools

import jax
import jax.numpy as jnp
from jax import lax
from jax.experimental import pallas as pl
from jax.experimental.pallas import tpu as pltpu


def _round_up(x, m):
    return ((x + m - 1) // m) * m


def _confusion_kernel(pred_ref, tgt_ref, cm_ref, *,
                      num_classes, robust, n_total, tile_n, steps_per_shard):
    s = pl.program_id(0)          # shard axis ("parallel", megacore)
    i = pl.program_id(1)          # batch-tile reduction axis ("arbitrary")

    @pl.when(i == 0)
    def _():
        cm_ref[...] = jnp.zeros_like(cm_ref)

    kp_r, kp_c = cm_ref.shape     # (8,128)-padded class dims

    # Logits tile: narrow dtype on the HBM wire, cast to f32 in vregs.
    logits = pred_ref[...].astype(jnp.float32)                 # (tile_n, C)
    tn, c = logits.shape
    if robust:
        # Mask (not slice) the robust column: keeps the tile layout intact.
        col = lax.broadcasted_iota(jnp.int32, (tn, c), 1)
        logits = jnp.where(col < num_classes, logits, -jnp.inf)

    # argmax along classes, first maximal index (torch.max tie-breaking).
    mx = jnp.max(logits, axis=1, keepdims=True)                # (tile_n, 1)
    cls_iota = lax.broadcasted_iota(jnp.int32, (tn, c), 1)
    pred_idx = jnp.min(jnp.where(logits == mx, cls_iota, c),
                       axis=1, keepdims=True)                  # (tile_n, 1)

    tgt = tgt_ref[...].astype(jnp.int32)                       # (1, tile_n)

    # Mask padded tail rows and clamped (overhanging) tiles of the last shard.
    nominal_block = s * steps_per_shard + i
    row_ids = nominal_block * tile_n + lax.broadcasted_iota(
        jnp.int32, (1, tn), 1)                                 # (1, tile_n)
    valid = row_ids < n_total

    # Target one-hot built pre-transposed (kp_r, tile_n): feeds the MXU with
    # no XLU transpose; padded class rows never match (targets < K <= kp_r).
    k_iota_t = lax.broadcasted_iota(jnp.int32, (kp_r, tn), 0)
    t_oh_t = ((tgt == k_iota_t) & valid).astype(jnp.bfloat16)

    # Prediction one-hot (tile_n, kp_c), lane-dense padded class axis.
    k_iota = lax.broadcasted_iota(jnp.int32, (tn, kp_c), 1)
    p_oh = (pred_idx == k_iota).astype(jnp.bfloat16)

    # CM[k, j] += sum_n t_oh_t[k, n] * p_oh[n, j]   (MXU, f32 accumulate
    # directly into the resident output block).
    cm_ref[...] += jnp.dot(t_oh_t, p_oh, preferred_element_type=jnp.float32)


def _pick_tile_n(n, c, itemsize):
    # Keep the double-buffered logits tile comfortably inside the scoped-VMEM
    # default: ~4 MiB per buffer, rows a multiple of 128, cap 8192.
    budget = 4 * 1024 * 1024
    t = budget // max(1, c * itemsize)
    t = max(128, min(8192, (t // 128) * 128))
    return t


def confusion_matrix_pallas(prediction, target, num_classes,
                            robust_logit_index=None, tile_n=None):
    """prediction: (N, C); target: (N,) int. Returns (K, K) float32."""
    robust = robust_logit_index is not None
    if robust:
        assert robust_logit_index == -1

    n, c = prediction.shape
    tgt_lane = target.reshape(1, n).astype(jnp.int32)          # lane-dense

    if tile_n is None:
        tile_n = _pick_tile_n(n, c, prediction.dtype.itemsize)
    if n <= tile_n:
        tile_n = n                                             # single block
    grid_steps = pl.cdiv(n, tile_n)

    # Split the batch reduction across TensorCores when there is enough work
    # (2 TCs on v7x; on single-TC chips the shard axis is just an outer loop).
    num_shards = 2 if grid_steps >= 2 else 1
    steps_per_shard = pl.cdiv(grid_steps, num_shards)
    last_block = grid_steps - 1

    # Pad class dims so the accumulator / output block is (8,128)-aligned:
    # unmasked, lane-dense stores on every accumulate.
    kp_r = max(8, _round_up(num_classes, 8))
    kp_c = max(128, _round_up(num_classes, 128))

    def pred_map(s, i):
        return (jnp.minimum(s * steps_per_shard + i, last_block), 0)

    def tgt_map(s, i):
        return (0, jnp.minimum(s * steps_per_shard + i, last_block))

    kernel = functools.partial(
        _confusion_kernel, num_classes=num_classes, robust=robust,
        n_total=n, tile_n=tile_n, steps_per_shard=steps_per_shard)

    partials = pl.pallas_call(
        kernel,
        out_shape=jax.ShapeDtypeStruct((num_shards, kp_r, kp_c), jnp.float32),
        grid=(num_shards, steps_per_shard),
        in_specs=[
            pl.BlockSpec((tile_n, c), pred_map),    # logits tile, native dtype
            pl.BlockSpec((1, tile_n), tgt_map),     # lane-dense target tile
        ],
        out_specs=pl.BlockSpec((pl.Squeezed(), kp_r, kp_c),
                               lambda s, i: (s, 0, 0)),
        compiler_params=pltpu.CompilerParams(
            dimension_semantics=("parallel", "arbitrary")),
    )(prediction, tgt_lane)

    # Tiny (num_shards, K, K) reduction + un-pad in the wrapper.
    return partials[:, :num_classes, :num_classes].sum(axis=0)


class ConfusionMatrix:
    """Minimal JAX analogue of the torch ConfusionMatrix holder."""

    def __init__(self, values, labels=None):
        self._values = values
        self.labels = labels

    def update(self, mat):
        self._values = self._values + mat._values

    # TODO(synk): .plot() builds a matplotlib figure; no Pallas equivalent.


class ConfusionMatrixMetric:
    """JAX/Pallas analogue of the PyTorch ConfusionMatrixMetric module."""

    def __init__(self, num_classes, robust_logit_index=None, labels=None):
        self.num_classes = num_classes
        self.labels = labels
        self.robust_logit_index = robust_logit_index
        if robust_logit_index is not None:
            assert robust_logit_index == -1

    def __call__(self, prediction, target):
        cm = confusion_matrix_pallas(prediction, target, self.num_classes,
                                     self.robust_logit_index)
        return ConfusionMatrix(cm, self.labels)


if __name__ == "__main__":
    key = jax.random.PRNGKey(0)
    k1, k2, k3, k4 = jax.random.split(key, 4)

    # --- Test 1: small batch, robust logit column, bf16 logits on the wire. ---
    num_classes = 4
    batch = 8
    prediction = jax.random.normal(
        k1, (batch, num_classes + 1), dtype=jnp.float32).astype(jnp.bfloat16)
    target = jax.random.randint(k2, (batch,), 0, num_classes, dtype=jnp.int32)

    metric = ConfusionMatrixMetric(num_classes, robust_logit_index=-1)
    cm = jax.block_until_ready(metric(prediction, target)._values)

    pred_idx = jnp.argmax(prediction[:, :num_classes].astype(jnp.float32), axis=1)
    cm_ref = jnp.zeros((num_classes, num_classes),
                       jnp.float32).at[target, pred_idx].add(1.0)
    assert cm.shape == (num_classes, num_classes)
    assert float(jnp.abs(cm - cm_ref).max()) == 0.0
    assert float(cm.sum()) == float(batch)

    # --- Test 2: batch tiling + core-shard split + padded-tail masking. ---
    n2 = 300  # not a multiple of the 128-row tile -> exercises the row mask
    pred2 = jax.random.normal(k3, (n2, num_classes), dtype=jnp.float32)
    tgt2 = jax.random.randint(k4, (n2,), 0, num_classes, dtype=jnp.int32)
    cm2 = jax.block_until_ready(
        confusion_matrix_pallas(pred2, tgt2, num_classes, None, tile_n=128))

    pred2_idx = jnp.argmax(pred2, axis=1)
    cm2_ref = jnp.zeros((num_classes, num_classes),
                        jnp.float32).at[tgt2, pred2_idx].add(1.0)
    assert float(jnp.abs(cm2 - cm2_ref).max()) == 0.0
    assert float(cm2.sum()) == float(n2)

    print("KERNEL_OK")
</pallas_src>

<mosaic_0001>
module attributes {stable_mosaic.version = 11 : i64} {
  func.func @_confusion_kernel(%arg0: i32, %arg1: i32, %arg2: memref<8x5xbf16, #tpu.memory_space<vmem>>, %arg3: memref<1x8xi32, #tpu.memory_space<vmem>>, %arg4: memref<1x8x128xf32, #tpu.memory_space<vmem>>) attributes {dimension_semantics = [#tpu.dimension_semantics<parallel>, #tpu.dimension_semantics<arbitrary>], iteration_bounds = array<i64: 1, 1>, scalar_prefetch = 0 : i64, scratch_operands = 0 : i64, tpu.core_type = #tpu.core_type<tc>, window_params = [{transform_indices = @transform_0, window_bounds = array<i64: 8, 5>}, {transform_indices = @transform_1, window_bounds = array<i64: 1, 8>}, {transform_indices = @transform_2, window_bounds = array<i64: 1, 8, 128>}]} {
    %c0_i32 = arith.constant 0 : i32
    %0 = arith.cmpi eq, %arg1, %c0_i32 : i32
    %1 = arith.extui %0 : i1 to i32
    %c0_i32_0 = arith.constant 0 : i32
    %2 = arith.cmpi ne, %1, %c0_i32_0 : i32
    scf.if %2 {
      %cst_14 = arith.constant 0.000000e+00 : f32
      %49 = vector.broadcast %cst_14 : f32 to vector<8x128xf32>
      %c0_15 = arith.constant 0 : index
      %c0_16 = arith.constant 0 : index
      %c0_17 = arith.constant 0 : index
      %50 = vector.load %arg4[%c0_15, %c0_16, %c0_17] : memref<1x8x128xf32, #tpu.memory_space<vmem>>, vector<1x8x128xf32>
      %51 = vector.shape_cast %50 : vector<1x8x128xf32> to vector<8x128xf32>
      %52 = vector.shape_cast %49 : vector<8x128xf32> to vector<1x8x128xf32>
      tpu.vector_store %arg4[%c0_15, %c0_16, %c0_17], %52 {strides = array<i32>} : memref<1x8x128xf32, #tpu.memory_space<vmem>>, vector<1x8x128xf32>,
    } else {
    }
    %c0 = arith.constant 0 : index
    %c0_1 = arith.constant 0 : index
    %3 = vector.load %arg2[%c0, %c0_1] : memref<8x5xbf16, #tpu.memory_space<vmem>>, vector<8x5xbf16>
    %4 = arith.extf %3 : vector<8x5xbf16> to vector<8x5xf32>
    %5 = tpu.iota {dimensions = array<i32: 1>} : vector<8x5xi32>
    %c4_i32 = arith.constant 4 : i32
    %6 = vector.broadcast %c4_i32 : i32 to vector<8x5xi32>
    %7 = arith.cmpi slt, %5, %6 : vector<8x5xi32>
    %cst = arith.constant 0xFF800000 : f32
    %8 = vector.broadcast %cst : f32 to vector<8x5xf32>
    %9 = arith.select %7, %4, %8 : vector<8x5xi1>, vector<8x5xf32>
    %cst_2 = arith.constant dense<0xFF800000> : vector<8xf32>
    %10 = vector.multi_reduction <maximumf>, %9, %cst_2 [1] : vector<8x5xf32> to vector<8xf32>
    %11 = vector.shape_cast %10 : vector<8xf32> to vector<8x1xf32>
    %12 = tpu.iota {dimensions = array<i32: 1>} : vector<8x5xi32>
    %13 = vector.broadcast %11 : vector<8x1xf32> to vector<8x5xf32>
    %14 = arith.cmpf oeq, %9, %13 : vector<8x5xf32>
    %c5_i32 = arith.constant 5 : i32
    %15 = vector.broadcast %c5_i32 : i32 to vector<8x5xi32>
    %16 = arith.select %14, %12, %15 : vector<8x5xi1>, vector<8x5xi32>
    %cst_3 = arith.constant dense<2147483647> : vector<8xi32>
    %17 = vector.multi_reduction <minsi>, %16, %cst_3 [1] : vector<8x5xi32> to vector<8xi32>
    %18 = vector.shape_cast %17 : vector<8xi32> to vector<8x1xi32>
    %c0_4 = arith.constant 0 : index
    %c0_5 = arith.constant 0 : index
    %19 = vector.load %arg3[%c0_4, %c0_5] : memref<1x8xi32, #tpu.memory_space<vmem>>, vector<1x8xi32>
    %c1_i32 = arith.constant 1 : i32
    %20 = arith.muli %arg0, %c1_i32 : i32
    %21 = arith.addi %20, %arg1 : i32
    %c8_i32 = arith.constant 8 : i32
    %22 = arith.muli %21, %c8_i32 : i32
    %23 = tpu.iota {dimensions = array<i32: 1>} : vector<1x8xi32>
    %24 = vector.broadcast %22 : i32 to vector<1x8xi32>
    %25 = arith.addi %24, %23 : vector<1x8xi32>
    %c8_i32_6 = arith.constant 8 : i32
    %26 = vector.broadcast %c8_i32_6 : i32 to vector<1x8xi32>
    %27 = arith.cmpi slt, %25, %26 : vector<1x8xi32>
    %28 = tpu.iota {dimensions = array<i32: 0>} : vector<8x8xi32>
    %29 = vector.broadcast %19 : vector<1x8xi32> to vector<8x8xi32>
    %30 = arith.cmpi eq, %29, %28 : vector<8x8xi32>
    %31 = vector.broadcast %27 : vector<1x8xi1> to vector<8x8xi1>
    %32 = arith.andi %30, %31 : vector<8x8xi1>
    %33 = arith.extui %32 : vector<8x8xi1> to vector<8x8xi32>
    %34 = arith.sitofp %33 : vector<8x8xi32> to vector<8x8xf32>
    %35 = arith.truncf %34 : vector<8x8xf32> to vector<8x8xbf16>
    %36 = tpu.iota {dimensions = array<i32: 1>} : vector<8x128xi32>
    %37 = vector.broadcast %18 : vector<8x1xi32> to vector<8x128xi32>
    %38 = arith.cmpi eq, %37, %36 : vector<8x128xi32>
    %39 = arith.extui %38 : vector<8x128xi1> to vector<8x128xi32>
    %40 = arith.sitofp %39 : vector<8x128xi32> to vector<8x128xf32>
    %41 = arith.truncf %40 : vector<8x128xf32> to vector<8x128xbf16>
    %c0_7 = arith.constant 0 : index
    %c0_8 = arith.constant 0 : index
    %c0_9 = arith.constant 0 : index
    %42 = vector.load %arg4[%c0_7, %c0_8, %c0_9] : memref<1x8x128xf32, #tpu.memory_space<vmem>>, vector<1x8x128xf32>
    %43 = vector.shape_cast %42 : vector<1x8x128xf32> to vector<8x128xf32>
    %cst_10 = arith.constant dense<0.000000e+00> : vector<8x128xf32>
    %44 = tpu.matmul %35, %41, %cst_10 {dimension_numbers = #tpu.dot_dimension_numbers<[1], [0], [0], [1], [0, 0, 1, 1], [], []>} : vector<8x8xbf16>, vector<8x128xbf16>, vector<8x128xf32> -> vector<8x128xf32>
    %45 = arith.addf %43, %44 : vector<8x128xf32>
    %c0_11 = arith.constant 0 : index
    %c0_12 = arith.constant 0 : index
    %c0_13 = arith.constant 0 : index
    %46 = vector.load %arg4[%c0_11, %c0_12, %c0_13] : memref<1x8x128xf32, #tpu.memory_space<vmem>>, vector<1x8x128xf32>
    %47 = vector.shape_cast %46 : vector<1x8x128xf32> to vector<8x128xf32>
    %48 = vector.shape_cast %45 : vector<8x128xf32> to vector<1x8x128xf32>
    tpu.vector_store %arg4[%c0_11, %c0_12, %c0_13], %48 {strides = array<i32>} : memref<1x8x128xf32, #tpu.memory_space<vmem>>, vector<1x8x128xf32>,
    return
  }
  func.func @transform_0(%arg0: i32, %arg1: i32) -> (i32, i32) {
    %c1_i32 = arith.constant 1 : i32
    %0 = arith.muli %arg0, %c1_i32 : i32
    %1 = arith.addi %0, %arg1 : i32
    %c0_i32 = arith.constant 0 : i32
    %2 = arith.minsi %1, %c0_i32 : i32
    %c0_i32_0 = arith.constant 0 : i32
    %c0_i32_1 = arith.constant 0 : i32
    return %2, %c0_i32_0 : i32, i32
  }
  func.func @transform_1(%arg0: i32, %arg1: i32) -> (i32, i32) {
    %c1_i32 = arith.constant 1 : i32
    %0 = arith.muli %arg0, %c1_i32 : i32
    %1 = arith.addi %0, %arg1 : i32
    %c0_i32 = arith.constant 0 : i32
    %2 = arith.minsi %1, %c0_i32 : i32
    %c0_i32_0 = arith.constant 0 : i32
    %c0_i32_1 = arith.constant 0 : i32
    return %c0_i32_0, %2 : i32, i32
  }
  func.func @transform_2(%arg0: i32, %arg1: i32) -> (i32, i32, i32) {
    %c0_i32 = arith.constant 0 : i32
    %c0_i32_0 = arith.constant 0 : i32
    %c0_i32_1 = arith.constant 0 : i32
    return %arg0, %c0_i32, %c0_i32_0 : i32, i32, i32
  }
}

</mosaic_0001>

<bundles_post_ra>
// kernel: tpu_custom_call.1
= control target key start
LH: loop header
LB: loop body
LE: loop exit
PB: predicated region body
PF: predicated region fallthrough
CT: control target
= control target key end

     0   :  { %7 = vsyncpa [#allocation3], 0  ;;  %s293_s0 = inlined_call_operand.hbm [shape: bf16[8,5], index: 0, kind: input, shape index: {}]   ;;  %s294_s1 = inlined_call_operand.vmem [shape: s32[1,8], index: 1, kind: input, shape index: {}]   ;;  %s295_s2 = inlined_call_operand.hbm [shape: f32[1,8,128], index: 2, kind: output, shape index: {}]  }
   0x1   :  { %8 = vsyncpa [#allocation4], 0  ;;  %s247_s9 = smov [#allocation2]   ;;  %s199_s13 = scalar_lea.hbm %s293_s0, 64 }
   0x2   :  { %s20_s10 = sshll.u32 %s247_s9, 4  ;;  %p200_p0 = scmp.ne.s32.totalorder %s293_s0, %s199_s13  ;;  %s21_s10 = int_to_ptr.vmem [resolvable:$true] %s20_s10 }
   0x3   :  { %p203_p1 = scmp.lt.u32.totalorder %s199_s13, %s293_s0 }
   0x5   :  { %p205_p2 = pnand %p203_p1, %p200_p0 }
   0x7   :  { %208 = shalt.err (!%p205_p2)
}
   0x8   :  { %s209_s18 = scalar_lea.vmem %s21_s10, 64  ;;  %p214_p4 = scmp.lt.s32.totalorder %s21_s10, %s21_s10 }
   0x9   :  { %p210_p3 = scmp.ne.s32.totalorder %s21_s10, %s209_s18  ;;  %p215_p5 = scmp.lt.s32.totalorder %s209_s18, %s209_s18 }
   0xb   :  { %p216_p6 = por %p215_p5, %p214_p4 }
   0xd   :  { %p217_p7 = pnand %p216_p6, %p210_p3 }
   0xf   :  { %220 = shalt.err (!%p217_p7)
}
  0x10   :  { %23 = dma.hbm_to_vmem [thread:$0]  %s293_s0, 64, %s21_s10, [#allocation3]  }
  0x11   :  { %243 = dma.done.wait [#allocation3], 64  }
  0x12   :  { %244 = vsyncadd [#allocation3], 4294967232  ;;  %v64_v0 = vlaneseq  ;;  %v248_v1 = vmov 0.0   ;;  %v62_v3 = vld [vmem:[#allocation2] sm:$0xf]  ;;  %vm68_vm1 = vcmask 39936  }
  0x13   :  { %189 = vmatprep.subr.bf16.mxu0 %v248_v1  ;;  %v63_v4 = vunpack.c.l.bf16 %v62_v3  ;;  %vm249_vm4 = vmmov 0   ;;  %v183_v18 = vld [vmem:[%s294_s1] ss:$0 sm:$0xff]  ;;  %vm117_vm9 = vcmask 1043456   ;;  %vm113_vm10 = vcmask 64512   ;;  %s250_s22 = smov [#allocation5]  }
  0x14   :  { %v65_v2 = vand.u32 127, %v64_v0  ;;  %191 = vmatprep.mubr.msk.bf16.mxu0 %vm249_vm4, %v248_v1  ;;  %v96_v16 = vshrl.u32 %v64_v0, 7  ;;  %s169_s23 = sshll.u32 %s250_s22, 4  ;;  %s170_s23 = int_to_ptr.vmem [resolvable:$true] %s169_s23 }
  0x15   :  { %s221_s1 = scalar_lea.vmem %s170_s23, 128  ;;  %p226_p9 = scmp.lt.s32.totalorder %s170_s23, %s170_s23 }
  0x16   :  { %vm66_vm0 = vcmp.lt.s32.totalorder %v65_v2, 4  ;;  %vm94_vm5 = vcmp.lt.s32.totalorder %v65_v2, 8  ;;  %vm101_vm6 = vcmp.eq.s32.totalorder %v183_v18, %v96_v16  ;;  %p222_p8 = scmp.ne.s32.totalorder %s170_s23, %s221_s1  ;;  %p227_p10 = scmp.lt.s32.totalorder %s221_s1, %s221_s1 }
  0x17   :  { %v67_v5 = vsel %vm66_vm0, %v63_v4, -inf  ;;  %vm104_vm7 = vmand %vm101_vm6, %vm94_vm5 }
  0x18   :  { %v69_v6 = vsel %vm68_vm1, %v67_v5, -inf  ;;  %v184_v24 = vsel %vm104_vm7, 1.0, %v248_v1  ;;  %p228_p11 = por %p227_p10, %p226_p9 }
  0x19   :  { %70 = vmax.xlane.f32.xlu0 %v69_v6  ;;  %v107_v27 = vpack.c.bf16 %v184_v24, %v184_v24 }
  0x1a   :  { %p229_p12 = pnand %p228_p11, %p222_p8 }
  0xa6   :  { %v71_v7 = vpop.xlane.xlu0 %70 }
  0xa7   :  { %vm72_vm2 = vcmp.eq.f32.partialorder %v67_v5, %v71_v7 }
  0xa8   :  { %v73_v8 = vsel %vm72_vm2, %v65_v2, 5 }
  0xa9   :  { %v74_v9 = vsel %vm68_vm1, %v73_v8, 2147483647 }
  0xaa   :  { %v76_v10 = vshra.s32 %v74_v9, 16  ;;  %v75_v12 = vand.u32 65535, %v74_v9 }
  0xac   :  { %v78_v11 = vcvt.s32.f32 %v76_v10  ;;  %v77_v14 = vcvt.s32.f32 %v75_v12 }
  0xae   :  { %79 = vmin.xlane.f32.xlu0 %v78_v11 }
 0x13b   :  { %v80_v13 = vpop.xlane.xlu0 %79 }
 0x13c   :  { %vm81_vm3 = vcmp.eq.f32.partialorder %v78_v11, %v80_v13  ;;  %v86_v17 = vcvt.f32.s32 %v80_v13 }
 0x13d   :  { %v82_v15 = vsel %vm81_vm3, %v77_v14, inf }
 0x13e   :  { %83 = vmin.xlane.f32.xlu1 %v82_v15  ;;  %v87_v20 = vshll.u32 %v86_v17, 16 }
 0x1cb   :  { %v84_v19 = vpop.xlane.xlu1 %83 }
 0x1cc   :  { %v85_v21 = vcvt.f32.s32 %v84_v19 }
 0x1ce   :  { %v88_v22 = vadd.s32 %v87_v20, %v85_v21 }
 0x1d0   :  { %vm108_vm8 = vcmp.eq.s32.totalorder %v88_v22, %v65_v2 }
 0x1d1   :  { %v185_v23 = vsel %vm108_vm8, 1.0, %v248_v1 }
 0x1d2   :  { %v111_v25 = vpack.c.bf16 %v185_v23, %v185_v23 }
 0x1d4   :  { %v119_v26 = vsel %vm117_vm9, %v111_v25, 0 }
 0x1d5   :  { %190 = vmatpush3.bf16.msra.mxu0 %v119_v26 }
 0x1d8   :  { %192 = vmatmul.mubr.msk.bf16.vlgmr.msra.gmra.mrb[0].mxu0 %vm113_vm10, %v107_v27 }
 0x2ab   :  { %v155_v28 = vpop.f32.mrb[0].mxu0 }
 0x2ac   :  { %v193_v29 = vpop.f32.mrb[1].mxu0  ;;  %162 = vst [vmem:[#allocation5] sm:$0xff] %v155_v28 }
 0x2ad   :  { %v158_v30 = vpop.f32.mrb[2].mxu0 }
 0x2ae   :  { %v194_v31 = vpop.f32.mrb[3].mxu0 }
 0x2af   :  { %232 = shalt.err (!%p229_p12)
}
 0x2b0   :  { %s233_s26 = scalar_lea.hbm %s295_s2, 128 }
 0x2b1   :  { %p234_p13 = scmp.ne.s32.totalorder %s295_s2, %s233_s26  ;;  %p237_p0 = scmp.lt.u32.totalorder %s233_s26, %s295_s2 }
 0x2b3   :  { %p239_p1 = pnand %p237_p0, %p234_p13 }
 0x2b5   :  { %242 = shalt.err (!%p239_p1)
}
 0x2b6   :  { %172 = dma.vmem_to_hbm [thread:$0]  %s170_s23, 128, %s295_s2, [#allocation4]  }
 0x2b7   :  { %245 = dma.done.wait [#allocation4], 128  }
 0x2b8   :  { %246 = vsyncadd [#allocation4], 4294967168 }
 0x2b9   :  { %176 = vsyncpa [#allocation3], 1 }
 0x2ba   :  { %177 = vsyncpa [#allocation4], 1 }

</bundles_post_ra>
